<compile_context>
chip_gen: v5e
topology: v5e:2x2
jax: 0.10.0
libtpu: 0.0.40
codegen_flags: <defaults>
</compile_context>

<pallas_src>
import numpy as np
import jax
import jax.numpy as jnp
from jax.experimental import pallas as pl
from jax.experimental.pallas import tpu as pltpu


_R_ROWS = 8                       # sublane-aligned accumulator rows
_LANES = 128
_TILE_CANDIDATES = (4096, 2048, 1024, 512, 256, 128, 64, 32, 16, 8)
_VMEM_INPUT_BUDGET = 8 * 1024 * 1024   # 4 streams x 2 pipeline buffers


def _round_up(x, m):
    return ((x + m - 1) // m) * m


def _fold(x, groups):
    # (groups*8, 128) -> (8, 128) sublane-aligned partial sum (pure VALU adds of
    # aligned vreg slabs); the cross-lane reduce happens exactly once, in the wrapper.
    return jnp.sum(x.reshape(groups, _R_ROWS, _LANES), axis=0)


# --------------------------------------------------------------------------- #
# Kernels
# --------------------------------------------------------------------------- #

def _make_unweighted_kernel(tile_rows):
    groups = tile_rows // _R_ROWS

    def kernel(mt_ref, mp_ref, at_ref, ap_ref, out_ref):
        @pl.when(pl.program_id(1) == 0)
        def _():
            out_ref[...] = jnp.zeros_like(out_ref)

        d_mem = mp_ref[...].astype(jnp.float32) - mt_ref[...].astype(jnp.float32)
        d_alpha = ap_ref[...].astype(jnp.float32) - at_ref[...].astype(jnp.float32)
        out_ref[0] += _fold(d_mem * d_mem, groups)
        out_ref[1] += _fold(d_alpha * d_alpha, groups)

    return kernel


def _make_weighted_kernel(num_weights, tile_rows):
    groups = tile_rows // _R_ROWS

    def kernel(steps_ref, edges_ref, mt_ref, mp_ref, at_ref, ap_ref, out_ref):
        @pl.when(pl.program_id(1) == 0)
        def _():
            out_ref[...] = jnp.zeros_like(out_ref)

        mem_true = mt_ref[...].astype(jnp.float32)
        d_mem = mp_ref[...].astype(jnp.float32) - mem_true
        d_alpha = ap_ref[...].astype(jnp.float32) - at_ref[...].astype(jnp.float32)
        out_ref[0] += _fold(d_mem * d_mem, groups)
        out_ref[1] += _fold(d_alpha * d_alpha, groups)

        # w(mem) - weights[0] via threshold compares against *prefetched* bucket
        # edges / step tables (no divide / floor / int cast / one-hot loop).
        # Out-of-range scores clamp to the first/last bucket.
        w_delta = jnp.zeros_like(mem_true)
        for k in range(num_weights - 1):
            w_delta = w_delta + jnp.where(mem_true >= edges_ref[k],
                                          steps_ref[k], jnp.float32(0.0))
        out_ref[2] += _fold(w_delta, groups)

    return kernel


# --------------------------------------------------------------------------- #
# Tiling / wrapper
# --------------------------------------------------------------------------- #

def _choose_tiling(rows, itemsize, tile_rows=None):
    # Always expose a 2-extent leading "parallel" axis so v7x's second TensorCore
    # is never idle; harmless (same total steps) on 1-TC chips.
    ncores = 2
    max_tile = max(_R_ROWS, _VMEM_INPUT_BUDGET // (4 * 2 * _LANES * itemsize))
    if tile_rows is None:
        tile_rows = _R_ROWS
        for t in _TILE_CANDIDATES:
            if t > max_tile:
                continue
            padded = _round_up(rows, t * ncores)
            # accept <=~25% padding waste (or one minimum tile-pair for tiny inputs)
            if padded - rows <= max(rows // 4, 2 * _R_ROWS):
                tile_rows = t
                break
    else:
        assert tile_rows % _R_ROWS == 0, "tile_rows must be a multiple of 8"
        assert tile_rows <= max_tile, "tile_rows exceeds the VMEM input budget"
    rows_padded = _round_up(rows, tile_rows * ncores)
    tiles_per_core = rows_padded // (tile_rows * ncores)
    return tile_rows, tiles_per_core, ncores, rows_padded


def mem_mse_loss(y_pred, y_true, weights=None, tile_rows=None):
    mem_true = jnp.asarray(y_true["score"]).reshape(-1)
    alpha_true = jnp.asarray(y_true["alpha"]).reshape(-1)
    mem_pred = jnp.asarray(y_pred["score"]).reshape(-1)
    alpha_pred = jnp.asarray(y_pred["alpha"]).reshape(-1)

    n = mem_true.shape[0]
    assert alpha_true.shape[0] == n and mem_pred.shape[0] == n and alpha_pred.shape[0] == n

    # Stream in bf16 only if everything already is bf16 (halves HBM bytes);
    # otherwise stream f32.  Accumulation is always f32 inside the kernel.
    if all(a.dtype.name == "bfloat16"
           for a in (mem_true, alpha_true, mem_pred, alpha_pred)):
        stream_dtype = jnp.bfloat16
    else:
        stream_dtype = jnp.float32
    itemsize = np.dtype(stream_dtype).itemsize

    rows = pl.cdiv(n, _LANES)
    tile_rows, tiles_per_core, ncores, rows_padded = _choose_tiling(rows, itemsize, tile_rows)
    n_padded = rows_padded * _LANES

    def prep(x):
        x = x.astype(stream_dtype)
        if n_padded != n:
            # Zero padding contributes 0 to every partial (squared diffs and w_delta).
            x = jnp.pad(x, (0, n_padded - n))
        return x.reshape(rows_padded, _LANES)

    mt, mp, at, ap = prep(mem_true), prep(mem_pred), prep(alpha_true), prep(alpha_pred)
    inv_n = 1.0 / float(n)

    def row_map(c, i, *prefetch):            # (core, tile[, prefetch refs]) -> row block
        return (c * tiles_per_core + i, 0)

    def out_map(c, i, *prefetch):            # resident per-core accumulator block
        return (c, 0, 0)

    tensor_spec = pl.BlockSpec((tile_rows, _LANES), row_map)

    tile_bytes = tile_rows * _LANES * itemsize
    vmem_need = 4 * 2 * tile_bytes + 2 * ncores * 3 * _R_ROWS * _LANES * 4
    cparams = pltpu.CompilerParams(
        dimension_semantics=("parallel", "arbitrary"),
        vmem_limit_bytes=int(min(32 << 20, max(16 << 20, vmem_need + (4 << 20)))),
    )
    bytes_accessed = 4 * rows_padded * _LANES * itemsize + ncores * 3 * _R_ROWS * _LANES * 4

    if weights is None:
        nout = 2
        kernel = _make_unweighted_kernel(tile_rows)
        grid_spec = pltpu.PrefetchScalarGridSpec(
            num_scalar_prefetch=0,
            grid=(ncores, tiles_per_core),
            in_specs=[tensor_spec] * 4,
            out_specs=pl.BlockSpec((nout, _R_ROWS, _LANES), out_map),
        )
        cost = pl.CostEstimate(flops=int(6 * rows_padded * _LANES),
                               transcendentals=0,
                               bytes_accessed=int(bytes_accessed))
        out = pl.pallas_call(
            kernel,
            out_shape=jax.ShapeDtypeStruct((ncores * nout, _R_ROWS, _LANES), jnp.float32),
            grid_spec=grid_spec,
            compiler_params=cparams,
            cost_estimate=cost,
        )(mt, mp, at, ap)
        partial = out.reshape(ncores, nout, _R_ROWS, _LANES).sum(axis=(0, 2, 3))
        return (partial[0] + partial[1]) * inv_n

    w_tab = jnp.asarray(weights, jnp.float32).reshape(-1)
    num_weights = int(w_tab.shape[0])
    assert num_weights >= 2, "need at least 2 bucket weights"
    bucket_width = 100.0 / (num_weights - 1)
    steps = w_tab[1:] - w_tab[:-1]                                               # (K-1,)
    edges = jnp.asarray(np.arange(1, num_weights) * bucket_width, jnp.float32)   # (K-1,)

    nout = 3
    kernel = _make_weighted_kernel(num_weights, tile_rows)
    grid_spec = pltpu.PrefetchScalarGridSpec(
        num_scalar_prefetch=2,                        # steps[] and edges[] tables -> SMEM
        grid=(ncores, tiles_per_core),
        in_specs=[tensor_spec] * 4,
        out_specs=pl.BlockSpec((nout, _R_ROWS, _LANES), out_map),
    )
    cost = pl.CostEstimate(
        flops=int((6 + 3 * (num_weights - 1)) * rows_padded * _LANES),
        transcendentals=0,
        bytes_accessed=int(bytes_accessed),
    )
    out = pl.pallas_call(
        kernel,
        out_shape=jax.ShapeDtypeStruct((ncores * nout, _R_ROWS, _LANES), jnp.float32),
        grid_spec=grid_spec,
        compiler_params=cparams,
        cost_estimate=cost,
    )(steps, edges, mt, mp, at, ap)

    partial = out.reshape(ncores, nout, _R_ROWS, _LANES).sum(axis=(0, 2, 3))
    sum_sq = partial[0] + partial[1]
    sum_w = partial[2] + float(n) * w_tab[0]     # add back the weights[0] baseline
    return (sum_w * inv_n) * (sum_sq * inv_n)    # mean(w) * (mse_mem + mse_alpha)


# --------------------------------------------------------------------------- #
# Pure-JAX reference (mirrors the PyTorch module; gather clamped to table range)
# --------------------------------------------------------------------------- #

def _reference_loss(y_pred, y_true, weights):
    mem_true = jnp.asarray(y_true["score"], jnp.float32)
    alpha_true = jnp.asarray(y_true["alpha"], jnp.float32)
    mem_pred = jnp.asarray(y_pred["score"], jnp.float32)
    alpha_pred = jnp.asarray(y_pred["alpha"], jnp.float32)
    mse_mem = jnp.mean((mem_pred - mem_true) ** 2)
    mse_alpha = jnp.mean((alpha_pred - alpha_true) ** 2)
    if weights is None:
        return mse_mem + mse_alpha
    w_tab = jnp.asarray(weights, jnp.float32)
    bucket_width = 100.0 / (w_tab.shape[0] - 1)
    idx = jnp.clip(jnp.floor(mem_true / bucket_width).astype(jnp.int32),
                   0, w_tab.shape[0] - 1)
    w = w_tab[idx]
    return jnp.mean(w * mse_mem) + jnp.mean(w * mse_alpha)


# --------------------------------------------------------------------------- #
# Demo / self-test
# --------------------------------------------------------------------------- #

if __name__ == "__main__":
    weights = np.linspace(0.5, 1.5, 11).astype(np.float32)   # bucket_width = 10

    def make_data(batch, key, dtype=jnp.float32):
        ka, kb, kc, kd = jax.random.split(key, 4)
        y_true = {
            "score": jax.random.uniform(ka, (batch,), jnp.float32, 0.0, 100.0).astype(dtype),
            "alpha": jax.random.uniform(kb, (batch,), jnp.float32, 0.0, 1.0).astype(dtype),
        }
        y_pred = {
            "score": jax.random.uniform(kc, (batch,), jnp.float32, 0.0, 100.0).astype(dtype),
            "alpha": jax.random.uniform(kd, (batch,), jnp.float32, 0.0, 1.0).astype(dtype),
        }
        return y_pred, y_true

    k1, k2, k3 = jax.random.split(jax.random.PRNGKey(0), 3)

    # Case 1: small batch that is NOT a multiple of 128 (exercises zero-padding),
    # weighted branch, f32 streams.
    y_pred, y_true = make_data(300, k1)
    loss_w = mem_mse_loss(y_pred, y_true, weights=weights)
    jax.block_until_ready(loss_w)
    ref_w = _reference_loss(y_pred, y_true, weights)
    assert np.allclose(np.asarray(loss_w), np.asarray(ref_w), rtol=1e-5, atol=1e-5), \
        (float(loss_w), float(ref_w))

    # Case 2: unweighted branch.
    loss_nw = mem_mse_loss(y_pred, y_true, weights=None)
    jax.block_until_ready(loss_nw)
    ref_nw = _reference_loss(y_pred, y_true, None)
    assert np.allclose(np.asarray(loss_nw), np.asarray(ref_nw), rtol=1e-5, atol=1e-5), \
        (float(loss_nw), float(ref_nw))

    # Case 3: bf16 streams + multi-tile accumulation across the "arbitrary" axis
    # (batch=4096, tile_rows=8 -> grid = (2 cores, 2 tiles/core)).
    y_pred3, y_true3 = make_data(4096, k3, dtype=jnp.bfloat16)
    loss3 = mem_mse_loss(y_pred3, y_true3, weights=weights, tile_rows=8)
    jax.block_until_ready(loss3)
    ref3 = _reference_loss(y_pred3, y_true3, weights)
    assert np.allclose(np.asarray(loss3), np.asarray(ref3), rtol=1e-4, atol=1e-3), \
        (float(loss3), float(ref3))

    print("KERNEL_OK")
</pallas_src>

<mosaic_0001>
module attributes {stable_mosaic.version = 11 : i64} {
  func.func @kernel(%arg0: i32, %arg1: i32, %arg2: memref<10xf32, #tpu.memory_space<smem>>, %arg3: memref<10xf32, #tpu.memory_space<smem>>, %arg4: memref<8x128xf32, #tpu.memory_space<vmem>>, %arg5: memref<8x128xf32, #tpu.memory_space<vmem>>, %arg6: memref<8x128xf32, #tpu.memory_space<vmem>>, %arg7: memref<8x128xf32, #tpu.memory_space<vmem>>, %arg8: memref<3x8x128xf32, #tpu.memory_space<vmem>>) attributes {dimension_semantics = [#tpu.dimension_semantics<parallel>, #tpu.dimension_semantics<arbitrary>], iteration_bounds = array<i64: 2, 1>, scalar_prefetch = 2 : i64, scratch_operands = 0 : i64, tpu.core_type = #tpu.core_type<tc>, window_params = [{transform_indices = @transform_0, window_bounds = array<i64: 8, 128>}, {transform_indices = @transform_1, window_bounds = array<i64: 8, 128>}, {transform_indices = @transform_2, window_bounds = array<i64: 8, 128>}, {transform_indices = @transform_3, window_bounds = array<i64: 8, 128>}, {transform_indices = @transform_4, window_bounds = array<i64: 3, 8, 128>}]} {
    %c0_i32 = arith.constant 0 : i32
    %0 = arith.cmpi eq, %arg1, %c0_i32 : i32
    %1 = arith.extui %0 : i1 to i32
    %c0_i32_0 = arith.constant 0 : i32
    %2 = arith.cmpi ne, %1, %c0_i32_0 : i32
    scf.if %2 {
      %cst_50 = arith.constant 0.000000e+00 : f32
      %116 = vector.broadcast %cst_50 : f32 to vector<3x8x128xf32>
      %c0_51 = arith.constant 0 : index
      %c0_52 = arith.constant 0 : index
      %c0_53 = arith.constant 0 : index
      %117 = vector.load %arg8[%c0_51, %c0_52, %c0_53] : memref<3x8x128xf32, #tpu.memory_space<vmem>>, vector<3x8x128xf32>
      tpu.vector_store %arg8[%c0_51, %c0_52, %c0_53], %116 {strides = array<i32>} : memref<3x8x128xf32, #tpu.memory_space<vmem>>, vector<3x8x128xf32>,
    } else {
    }
    %c0 = arith.constant 0 : index
    %c0_1 = arith.constant 0 : index
    %3 = vector.load %arg4[%c0, %c0_1] : memref<8x128xf32, #tpu.memory_space<vmem>>, vector<8x128xf32>
    %c0_2 = arith.constant 0 : index
    %c0_3 = arith.constant 0 : index
    %4 = vector.load %arg5[%c0_2, %c0_3] : memref<8x128xf32, #tpu.memory_space<vmem>>, vector<8x128xf32>
    %5 = arith.subf %4, %3 : vector<8x128xf32>
    %c0_4 = arith.constant 0 : index
    %c0_5 = arith.constant 0 : index
    %6 = vector.load %arg7[%c0_4, %c0_5] : memref<8x128xf32, #tpu.memory_space<vmem>>, vector<8x128xf32>
    %c0_6 = arith.constant 0 : index
    %c0_7 = arith.constant 0 : index
    %7 = vector.load %arg6[%c0_6, %c0_7] : memref<8x128xf32, #tpu.memory_space<vmem>>, vector<8x128xf32>
    %8 = arith.subf %6, %7 : vector<8x128xf32>
    %c0_8 = arith.constant 0 : index
    %c0_9 = arith.constant 0 : index
    %c0_10 = arith.constant 0 : index
    %9 = vector.load %arg8[%c0_8, %c0_9, %c0_10] : memref<3x8x128xf32, #tpu.memory_space<vmem>>, vector<1x8x128xf32>
    %10 = vector.shape_cast %9 : vector<1x8x128xf32> to vector<8x128xf32>
    %11 = arith.mulf %5, %5 : vector<8x128xf32>
    %12 = vector.shape_cast %11 : vector<8x128xf32> to vector<1x8x128xf32>
    %cst = arith.constant dense<0.000000e+00> : vector<8x128xf32>
    %13 = vector.multi_reduction <add>, %12, %cst [0] : vector<1x8x128xf32> to vector<8x128xf32>
    %14 = arith.addf %10, %13 : vector<8x128xf32>
    %c0_11 = arith.constant 0 : index
    %c0_12 = arith.constant 0 : index
    %c0_13 = arith.constant 0 : index
    %15 = vector.load %arg8[%c0_11, %c0_12, %c0_13] : memref<3x8x128xf32, #tpu.memory_space<vmem>>, vector<1x8x128xf32>
    %16 = vector.shape_cast %15 : vector<1x8x128xf32> to vector<8x128xf32>
    %17 = vector.shape_cast %14 : vector<8x128xf32> to vector<1x8x128xf32>
    tpu.vector_store %arg8[%c0_11, %c0_12, %c0_13], %17 {strides = array<i32>} : memref<3x8x128xf32, #tpu.memory_space<vmem>>, vector<1x8x128xf32>,
    %c1 = arith.constant 1 : index
    %c0_14 = arith.constant 0 : index
    %c0_15 = arith.constant 0 : index
    %18 = vector.load %arg8[%c1, %c0_14, %c0_15] : memref<3x8x128xf32, #tpu.memory_space<vmem>>, vector<1x8x128xf32>
    %19 = vector.shape_cast %18 : vector<1x8x128xf32> to vector<8x128xf32>
    %20 = arith.mulf %8, %8 : vector<8x128xf32>
    %21 = vector.shape_cast %20 : vector<8x128xf32> to vector<1x8x128xf32>
    %cst_16 = arith.constant dense<0.000000e+00> : vector<8x128xf32>
    %22 = vector.multi_reduction <add>, %21, %cst_16 [0] : vector<1x8x128xf32> to vector<8x128xf32>
    %23 = arith.addf %19, %22 : vector<8x128xf32>
    %c1_17 = arith.constant 1 : index
    %c0_18 = arith.constant 0 : index
    %c0_19 = arith.constant 0 : index
    %24 = vector.load %arg8[%c1_17, %c0_18, %c0_19] : memref<3x8x128xf32, #tpu.memory_space<vmem>>, vector<1x8x128xf32>
    %25 = vector.shape_cast %24 : vector<1x8x128xf32> to vector<8x128xf32>
    %26 = vector.shape_cast %23 : vector<8x128xf32> to vector<1x8x128xf32>
    tpu.vector_store %arg8[%c1_17, %c0_18, %c0_19], %26 {strides = array<i32>} : memref<3x8x128xf32, #tpu.memory_space<vmem>>, vector<1x8x128xf32>,
    %cst_20 = arith.constant 0.000000e+00 : f32
    %27 = vector.broadcast %cst_20 : f32 to vector<8x128xf32>
    %c0_21 = arith.constant 0 : index
    %28 = memref.load %arg3[%c0_21] : memref<10xf32, #tpu.memory_space<smem>>
    %29 = vector.broadcast %28 : f32 to vector<8x128xf32>
    %30 = arith.cmpf oge, %3, %29 : vector<8x128xf32>
    %c0_22 = arith.constant 0 : index
    %31 = memref.load %arg2[%c0_22] : memref<10xf32, #tpu.memory_space<smem>>
    %cst_23 = arith.constant 0.000000e+00 : f32
    %32 = vector.broadcast %31 : f32 to vector<8x128xf32>
    %33 = vector.broadcast %cst_23 : f32 to vector<8x128xf32>
    %34 = arith.select %30, %32, %33 : vector<8x128xi1>, vector<8x128xf32>
    %35 = arith.addf %27, %34 : vector<8x128xf32>
    %c1_24 = arith.constant 1 : index
    %36 = memref.load %arg3[%c1_24] : memref<10xf32, #tpu.memory_space<smem>>
    %37 = vector.broadcast %36 : f32 to vector<8x128xf32>
    %38 = arith.cmpf oge, %3, %37 : vector<8x128xf32>
    %c1_25 = arith.constant 1 : index
    %39 = memref.load %arg2[%c1_25] : memref<10xf32, #tpu.memory_space<smem>>
    %cst_26 = arith.constant 0.000000e+00 : f32
    %40 = vector.broadcast %39 : f32 to vector<8x128xf32>
    %41 = vector.broadcast %cst_26 : f32 to vector<8x128xf32>
    %42 = arith.select %38, %40, %41 : vector<8x128xi1>, vector<8x128xf32>
    %43 = arith.addf %35, %42 : vector<8x128xf32>
    %c2 = arith.constant 2 : index
    %44 = memref.load %arg3[%c2] : memref<10xf32, #tpu.memory_space<smem>>
    %45 = vector.broadcast %44 : f32 to vector<8x128xf32>
    %46 = arith.cmpf oge, %3, %45 : vector<8x128xf32>
    %c2_27 = arith.constant 2 : index
    %47 = memref.load %arg2[%c2_27] : memref<10xf32, #tpu.memory_space<smem>>
    %cst_28 = arith.constant 0.000000e+00 : f32
    %48 = vector.broadcast %47 : f32 to vector<8x128xf32>
    %49 = vector.broadcast %cst_28 : f32 to vector<8x128xf32>
    %50 = arith.select %46, %48, %49 : vector<8x128xi1>, vector<8x128xf32>
    %51 = arith.addf %43, %50 : vector<8x128xf32>
    %c3 = arith.constant 3 : index
    %52 = memref.load %arg3[%c3] : memref<10xf32, #tpu.memory_space<smem>>
    %53 = vector.broadcast %52 : f32 to vector<8x128xf32>
    %54 = arith.cmpf oge, %3, %53 : vector<8x128xf32>
    %c3_29 = arith.constant 3 : index
    %55 = memref.load %arg2[%c3_29] : memref<10xf32, #tpu.memory_space<smem>>
    %cst_30 = arith.constant 0.000000e+00 : f32
    %56 = vector.broadcast %55 : f32 to vector<8x128xf32>
    %57 = vector.broadcast %cst_30 : f32 to vector<8x128xf32>
    %58 = arith.select %54, %56, %57 : vector<8x128xi1>, vector<8x128xf32>
    %59 = arith.addf %51, %58 : vector<8x128xf32>
    %c4 = arith.constant 4 : index
    %60 = memref.load %arg3[%c4] : memref<10xf32, #tpu.memory_space<smem>>
    %61 = vector.broadcast %60 : f32 to vector<8x128xf32>
    %62 = arith.cmpf oge, %3, %61 : vector<8x128xf32>
    %c4_31 = arith.constant 4 : index
    %63 = memref.load %arg2[%c4_31] : memref<10xf32, #tpu.memory_space<smem>>
    %cst_32 = arith.constant 0.000000e+00 : f32
    %64 = vector.broadcast %63 : f32 to vector<8x128xf32>
    %65 = vector.broadcast %cst_32 : f32 to vector<8x128xf32>
    %66 = arith.select %62, %64, %65 : vector<8x128xi1>, vector<8x128xf32>
    %67 = arith.addf %59, %66 : vector<8x128xf32>
    %c5 = arith.constant 5 : index
    %68 = memref.load %arg3[%c5] : memref<10xf32, #tpu.memory_space<smem>>
    %69 = vector.broadcast %68 : f32 to vector<8x128xf32>
    %70 = arith.cmpf oge, %3, %69 : vector<8x128xf32>
    %c5_33 = arith.constant 5 : index
    %71 = memref.load %arg2[%c5_33] : memref<10xf32, #tpu.memory_space<smem>>
    %cst_34 = arith.constant 0.000000e+00 : f32
    %72 = vector.broadcast %71 : f32 to vector<8x128xf32>
    %73 = vector.broadcast %cst_34 : f32 to vector<8x128xf32>
    %74 = arith.select %70, %72, %73 : vector<8x128xi1>, vector<8x128xf32>
    %75 = arith.addf %67, %74 : vector<8x128xf32>
    %c6 = arith.constant 6 : index
    %76 = memref.load %arg3[%c6] : memref<10xf32, #tpu.memory_space<smem>>
    %77 = vector.broadcast %76 : f32 to vector<8x128xf32>
    %78 = arith.cmpf oge, %3, %77 : vector<8x128xf32>
    %c6_35 = arith.constant 6 : index
    %79 = memref.load %arg2[%c6_35] : memref<10xf32, #tpu.memory_space<smem>>
    %cst_36 = arith.constant 0.000000e+00 : f32
    %80 = vector.broadcast %79 : f32 to vector<8x128xf32>
    %81 = vector.broadcast %cst_36 : f32 to vector<8x128xf32>
    %82 = arith.select %78, %80, %81 : vector<8x128xi1>, vector<8x128xf32>
    %83 = arith.addf %75, %82 : vector<8x128xf32>
    %c7 = arith.constant 7 : index
    %84 = memref.load %arg3[%c7] : memref<10xf32, #tpu.memory_space<smem>>
    %85 = vector.broadcast %84 : f32 to vector<8x128xf32>
    %86 = arith.cmpf oge, %3, %85 : vector<8x128xf32>
    %c7_37 = arith.constant 7 : index
    %87 = memref.load %arg2[%c7_37] : memref<10xf32, #tpu.memory_space<smem>>
    %cst_38 = arith.constant 0.000000e+00 : f32
    %88 = vector.broadcast %87 : f32 to vector<8x128xf32>
    %89 = vector.broadcast %cst_38 : f32 to vector<8x128xf32>
    %90 = arith.select %86, %88, %89 : vector<8x128xi1>, vector<8x128xf32>
    %91 = arith.addf %83, %90 : vector<8x128xf32>
    %c8 = arith.constant 8 : index
    %92 = memref.load %arg3[%c8] : memref<10xf32, #tpu.memory_space<smem>>
    %93 = vector.broadcast %92 : f32 to vector<8x128xf32>
    %94 = arith.cmpf oge, %3, %93 : vector<8x128xf32>
    %c8_39 = arith.constant 8 : index
    %95 = memref.load %arg2[%c8_39] : memref<10xf32, #tpu.memory_space<smem>>
    %cst_40 = arith.constant 0.000000e+00 : f32
    %96 = vector.broadcast %95 : f32 to vector<8x128xf32>
    %97 = vector.broadcast %cst_40 : f32 to vector<8x128xf32>
    %98 = arith.select %94, %96, %97 : vector<8x128xi1>, vector<8x128xf32>
    %99 = arith.addf %91, %98 : vector<8x128xf32>
    %c9 = arith.constant 9 : index
    %100 = memref.load %arg3[%c9] : memref<10xf32, #tpu.memory_space<smem>>
    %101 = vector.broadcast %100 : f32 to vector<8x128xf32>
    %102 = arith.cmpf oge, %3, %101 : vector<8x128xf32>
    %c9_41 = arith.constant 9 : index
    %103 = memref.load %arg2[%c9_41] : memref<10xf32, #tpu.memory_space<smem>>
    %cst_42 = arith.constant 0.000000e+00 : f32
    %104 = vector.broadcast %103 : f32 to vector<8x128xf32>
    %105 = vector.broadcast %cst_42 : f32 to vector<8x128xf32>
    %106 = arith.select %102, %104, %105 : vector<8x128xi1>, vector<8x128xf32>
    %107 = arith.addf %99, %106 : vector<8x128xf32>
    %c2_43 = arith.constant 2 : index
    %c0_44 = arith.constant 0 : index
    %c0_45 = arith.constant 0 : index
    %108 = vector.load %arg8[%c2_43, %c0_44, %c0_45] : memref<3x8x128xf32, #tpu.memory_space<vmem>>, vector<1x8x128xf32>
    %109 = vector.shape_cast %108 : vector<1x8x128xf32> to vector<8x128xf32>
    %110 = vector.shape_cast %107 : vector<8x128xf32> to vector<1x8x128xf32>
    %cst_46 = arith.constant dense<0.000000e+00> : vector<8x128xf32>
    %111 = vector.multi_reduction <add>, %110, %cst_46 [0] : vector<1x8x128xf32> to vector<8x128xf32>
    %112 = arith.addf %109, %111 : vector<8x128xf32>
    %c2_47 = arith.constant 2 : index
    %c0_48 = arith.constant 0 : index
    %c0_49 = arith.constant 0 : index
    %113 = vector.load %arg8[%c2_47, %c0_48, %c0_49] : memref<3x8x128xf32, #tpu.memory_space<vmem>>, vector<1x8x128xf32>
    %114 = vector.shape_cast %113 : vector<1x8x128xf32> to vector<8x128xf32>
    %115 = vector.shape_cast %112 : vector<8x128xf32> to vector<1x8x128xf32>
    tpu.vector_store %arg8[%c2_47, %c0_48, %c0_49], %115 {strides = array<i32>} : memref<3x8x128xf32, #tpu.memory_space<vmem>>, vector<1x8x128xf32>,
    return
  }
  func.func @transform_0(%arg0: i32, %arg1: i32, %arg2: memref<10xf32, #tpu.memory_space<smem>>, %arg3: memref<10xf32, #tpu.memory_space<smem>>) -> (i32, i32) {
    %c1_i32 = arith.constant 1 : i32
    %0 = arith.muli %arg0, %c1_i32 : i32
    %1 = arith.addi %0, %arg1 : i32
    %c0_i32 = arith.constant 0 : i32
    %c0_i32_0 = arith.constant 0 : i32
    return %1, %c0_i32 : i32, i32
  }
  func.func @transform_1(%arg0: i32, %arg1: i32, %arg2: memref<10xf32, #tpu.memory_space<smem>>, %arg3: memref<10xf32, #tpu.memory_space<smem>>) -> (i32, i32) {
    %c1_i32 = arith.constant 1 : i32
    %0 = arith.muli %arg0, %c1_i32 : i32
    %1 = arith.addi %0, %arg1 : i32
    %c0_i32 = arith.constant 0 : i32
    %c0_i32_0 = arith.constant 0 : i32
    return %1, %c0_i32 : i32, i32
  }
  func.func @transform_2(%arg0: i32, %arg1: i32, %arg2: memref<10xf32, #tpu.memory_space<smem>>, %arg3: memref<10xf32, #tpu.memory_space<smem>>) -> (i32, i32) {
    %c1_i32 = arith.constant 1 : i32
    %0 = arith.muli %arg0, %c1_i32 : i32
    %1 = arith.addi %0, %arg1 : i32
    %c0_i32 = arith.constant 0 : i32
    %c0_i32_0 = arith.constant 0 : i32
    return %1, %c0_i32 : i32, i32
  }
  func.func @transform_3(%arg0: i32, %arg1: i32, %arg2: memref<10xf32, #tpu.memory_space<smem>>, %arg3: memref<10xf32, #tpu.memory_space<smem>>) -> (i32, i32) {
    %c1_i32 = arith.constant 1 : i32
    %0 = arith.muli %arg0, %c1_i32 : i32
    %1 = arith.addi %0, %arg1 : i32
    %c0_i32 = arith.constant 0 : i32
    %c0_i32_0 = arith.constant 0 : i32
    return %1, %c0_i32 : i32, i32
  }
  func.func @transform_4(%arg0: i32, %arg1: i32, %arg2: memref<10xf32, #tpu.memory_space<smem>>, %arg3: memref<10xf32, #tpu.memory_space<smem>>) -> (i32, i32, i32) {
    %c0_i32 = arith.constant 0 : i32
    %c0_i32_0 = arith.constant 0 : i32
    %c0_i32_1 = arith.constant 0 : i32
    return %arg0, %c0_i32, %c0_i32_0 : i32, i32, i32
  }
}

</mosaic_0001>

<bundles_post_ra>
// kernel: tpu_custom_call.1
= control target key start
LH: loop header
LB: loop body
LE: loop exit
PB: predicated region body
PF: predicated region fallthrough
CT: control target
= control target key end

     0   :  { %s1003_s27 = smov [#allocation3]   ;;  %s1004_s28 = smov [#allocation4]   ;;  %s1247_s0 = inlined_call_operand.hbm [shape: f32[10], index: 0, kind: input, shape index: {}]   ;;  %s1248_s2 = inlined_call_operand.hbm [shape: f32[16,128], index: 2, kind: input, shape index: {}]   ;;  %s1249_s3 = inlined_call_operand.hbm [shape: f32[16,128], index: 3, kind: input, shape index: {}]   ;;  %s1250_s4 = inlined_call_operand.hbm [shape: f32[16,128], index: 4, kind: input, shape index: {}]   ;;  %s1251_s5 = inlined_call_operand.hbm [shape: f32[16,128], index: 5, kind: input, shape index: {}]   ;;  %s1252_s6 = inlined_call_operand.hbm [shape: f32[6,8,128], index: 6, kind: output, shape index: {}]   ;;  %s1253_s1 = inlined_call_operand.hbm [shape: f32[10], index: 1, kind: input, shape index: {}]  }
   0x1   :  { %1259 = sst [smem:[#allocation24_spill]] %s1248_s2  ;;  %s12_s23 = sshll.u32 %s1247_s0, 4  ;;  %s13_s23 = int_to_ptr.hbm [resolvable:$true] %s12_s23 }
   0x2   :  { %1260 = sst [smem:[#allocation25_spill]] %s1249_s3  ;;  %s17_s26 = sshll.u32 %s1253_s1, 4  ;;  %s18_s26 = int_to_ptr.hbm [resolvable:$true] %s17_s26 }
   0x3   :  { %15 = dma.hbm_to_smem %s13_s23, 16, %s1003_s27, [#allocation2] }
   0x4   :  { %20 = dma.hbm_to_smem %s18_s26, 16, %s1004_s28, [#allocation2] }
   0x5   :  { %961 = dma.done.wait [#allocation2], 32 }
   0x6   :  { %962 = vsyncadd [#allocation2], 4294967264 }
   0x7   :  { %23 = sfence }
   0x8   :  { %24 = vsyncpa [#allocation6], 0 }
   0x9   :  { %26 = vsyncpa [#allocation6 + $0x1], 0 }
   0xa   :  { %27 = vsyncpa [#allocation9], 0 }
   0xb   :  { %29 = vsyncpa [#allocation9 + $0x1], 0 }
   0xc   :  { %30 = vsyncpa [#allocation12], 0 }
   0xd   :  { %32 = vsyncpa [#allocation12 + $0x1], 0 }
   0xe   :  { %33 = vsyncpa [#allocation7], 0 }
   0xf   :  { %35 = vsyncpa [#allocation7 + $0x1], 0  ;;  %s1048_s0 = smov 0   ;;  %s1050_s1 = smov 0  }
  0x10   :  { %s1052_s29 = smov 0   ;;  %s1054_s30 = smov 0  }
  0x11   :  { %s1056_s7 = smov 0   ;;  %s1058_s8 = smov 0  }
  0x12 LB: > { %1261 = sst [smem:[#allocation19_spill]] %s989_s29  ;;  %s1079_s9 = sadd.s32 4294967295, %s1001_s8   ;;  %s1001_s8 = sphi %s1058_s8, %s41_s8   ;;  %s997_s7 = sphi %s1056_s7, %s1278_s7   ;;  %s993_s30 = sphi %s1054_s30, %s1277_s30   ;;  %s989_s29 = sphi %s1052_s29, %s1281_s29   ;;  %s985_s1 = sphi %s1050_s1, %s1280_s1   ;;  %s981_s0 = sphi %s1048_s0, %s1279_s0  }
  0x13   : > { %1262 = sst [smem:[#allocation20_spill]] %s997_s7  ;;  %s640_s10 = sadd.s32 4294967294, %s1001_s8  }
  0x14   : > { %1263 = sst [smem:[#allocation21_spill]] %s1001_s8  ;;  %s53_s11 = sadd.s32 1, %s997_s7 }
  0x15   : > { %s62_s12 = sadd.s32 1, %s989_s29  ;;  %p55_p0 = scmp.ge.s32.totalorder %s53_s11, 2 }
  0x16   : > { %p69_p1 = scmp.ne.s32.totalorder %s989_s29, %s985_s1  ;;  %p70_p2 = scmp.eq.s32.totalorder %s1001_s8, 0 }
  0x17   : > { %p75_p3 = scmp.ne.s32.totalorder %s985_s1, %s981_s0  ;;  %s1283_s11 = smov (%p55_p0, %s53_s11), 0 }
  0x18   : > { %1264 = sst [smem:[#allocation22_spill]] %s1283_s11  ;;  %p1091_p4 = por %p70_p2, %p69_p1 }
  0x19   : > { %p76_p5 = scmp.eq.s32.totalorder %s1079_s9, 0  ;;  %s59_s14 = ssub.s32 %s997_s7, %s1283_s11 }
  0x1a   : > { %p183_p6 = scmp.eq.s32.totalorder %s1079_s9, 1  ;;  %p60_p7 = scmp.eq.s32.totalorder %s59_s14, 0 }
  0x1b   : > { %p1099_p8 = por %p76_p5, %p75_p3  ;;  %p189_p10 = scmp.eq.s32.totalorder %s640_s10, 1 }
  0x1c   : > { %p1103_p9 = por %p183_p6, %p69_p1  ;;  %p642_p12 = scmp.ge.s32.totalorder %s1001_s8, 2 }
  0x1d   : > { %s1108_s17 = scalar_select %p60_p7, %s989_s29, %s62_s12  }
  0x1e   : > { %p1110_p11 = por %p189_p10, %p75_p3  ;;  %p710_p13 = scmp.lt.s32.totalorder %s1001_s8, 2 }
  0x1f   : > { %1268 = sst [smem:[#allocation23_spill]] %s1108_s17  ;;  %s1117_s19 = sand.u32 1, %s989_s29  }
  0x20   : > { %s1120_s20 = sshll.u32 %s1117_s19, 3  ;;  %s1123_s21 = sshll.u32 %s997_s7, 3 }
  0x21   : > { %p1127_p0 = pnand %p710_p13, %p1091_p4  ;;  %s229_s23 = sand.u32 1, %s1001_s8  }
  0x22   : > { %s1271_s3 = sld [smem:[#allocation25_spill]]  ;;  %s233_s28 = scalar_lea.vmem [#allocation8], %s1120_s20 }
  0x23   : > { %s242_s10 = sshll.u32 %s233_s28, 4  ;;  %s230_s12 = scalar_lea.sflag [#allocation9], %s229_s23  ;;  %s243_s10 = int_to_ptr.vmem [resolvable:$true] %s242_s10 }
  0x24   : > { %p651_p1 = scmp.ge.s32.totalorder %s1001_s8, 1  ;;  %p287_p2 = scmp.lt.s32.totalorder %s1001_s8, 3 }
  0x25   : > { %s1273_s2 = sld [smem:[#allocation24_spill]]  ;;  %s213_s28 = scalar_lea.vmem [#allocation5], %s1120_s20 }
  0x26   : > { %p1141_p3 = pnand %p651_p1, %p287_p2  ;;  %s210_s23 = scalar_lea.sflag [#allocation6], %s1117_s19 }
  0x27   : > { %s258_s11 = scalar_lea.hbm %s1250_s4, %s1123_s21  ;;  %s253_s17 = scalar_lea.vmem [#allocation10], %s1120_s20 }
  0x28   : > { %s238_s26 = scalar_lea.hbm %s1271_s3, %s1123_s21  ;;  %s222_s3 = sshll.u32 %s213_s28, 4  ;;  %s223_s3 = int_to_ptr.vmem [resolvable:$true] %s222_s3 }
  0x29   : > { %s240_s27 = sshll.u32 %s238_s26, 4  ;;  %s260_s7 = sshll.u32 %s258_s11, 4  ;;  %s241_s27 = int_to_ptr.hbm [resolvable:$true] %s240_s27  ;;  %s261_s7 = int_to_ptr.hbm [resolvable:$true] %s260_s7 }
  0x2a   : > { %699 = dma.hbm_to_vmem [thread:$0]  (!%p1127_p0), %s241_s27, 128, %s243_s10, %s230_s12  }
  0x2b   : > { %s218_s25 = scalar_lea.hbm %s1273_s2, %s1123_s21  ;;  %s262_s14 = sshll.u32 %s253_s17, 4  ;;  %s263_s14 = int_to_ptr.vmem [resolvable:$true] %s262_s14 }
  0x2c   : > { %s220_s26 = sshll.u32 %s218_s25, 4  ;;  %s278_s28 = scalar_lea.hbm %s1251_s5, %s1123_s21  ;;  %s221_s26 = int_to_ptr.hbm [resolvable:$true] %s220_s26 }
  0x2d   : > { %696 = dma.hbm_to_vmem [thread:$0]  (!%p1127_p0), %s221_s26, 128, %s223_s3, %s210_s23  }
  0x2e   : > { %702 = dma.hbm_to_vmem [thread:$0]  (!%p1127_p0), %s261_s7, 128, %s263_s14, %s230_s12  }
  0x2f   : > { %s273_s2 = scalar_lea.vmem [#allocation11], %s1120_s20  ;;  %s280_s8 = sshll.u32 %s278_s28, 4  ;;  %s281_s8 = int_to_ptr.hbm [resolvable:$true] %s280_s8 }
  0x30   : > { %s282_s29 = sshll.u32 %s273_s2, 4  ;;  %s270_s3 = scalar_lea.sflag [#allocation12], %s1117_s19  ;;  %s283_s29 = int_to_ptr.vmem [resolvable:$true] %s282_s29 }
  0x31   : > { %705 = dma.hbm_to_vmem [thread:$0]  (!%p1127_p0), %s281_s8, 128, %s283_s29, %s270_s3  }
  0x32   : > { %291 = sbr.rel (%p1141_p3) target bundleno = 95 (0x5f), region = 36  ;;  %s1171_s11 = sand.u32 (!%p1141_p3), 1, %s985_s1  }
  0x33   : > { %s652_s7 = sshll.u32 (!%p1141_p3), %s1171_s11, 3  ;;  %s294_s17 = scalar_lea.sflag (!%p1141_p3), [#allocation6], %s1171_s11 }
  0x34   : > { %s297_s21 = scalar_lea.vmem (!%p1141_p3), [#allocation5], %s652_s7 }
  0x37   : > { %964 = dma.done.wait (%p1099_p8), %s294_s17, 128  }
  0x38   : > { %966 = vsyncadd (%p1099_p8), %s294_s17, 4294967168  ;;  %s303_s2 = sand.u32 1, %s1079_s9   ;;  %s307_s8 = scalar_lea.vmem [#allocation8], %s652_s7 }
  0x39   : > { %s304_s29 = scalar_lea.sflag [#allocation9], %s303_s2 }
  0x3a   : > { %968 = dma.done.wait (%p1099_p8), %s304_s29, 256  }
  0x3b   : > { %970 = vsyncadd (%p1099_p8), %s304_s29, 4294967040  ;;  %s317_s19 = scalar_lea.vmem [#allocation10], %s652_s7  ;;  %s324_s20 = scalar_lea.sflag [#allocation12], %s1171_s11 }
  0x3c   : > { %s327_s22 = scalar_lea.vmem [#allocation11], %s652_s7 }
  0x3d   : > { %972 = dma.done.wait (%p1099_p8), %s324_s20, 128  }
  0x3e   : > { %974 = vsyncadd (%p1099_p8), %s324_s20, 4294967168  ;;  %s397_s12 = sld [smem:[#allocation4]]  ;;  %s682_s10 = smul.u32 24, %s1171_s11  ;;  %v1190_v0 = vld [vmem:[%s297_s21] sm:$0xff]  ;;  %v381_v1 = vld [vmem:[%s307_s8] sm:$0xff] }
  0x3f   : > { %s400_s9 = sld [smem:[#allocation3]]  ;;  %v383_v2 = vld [vmem:[%s327_s22] sm:$0xff]  ;;  %v382_v4 = vsub.f32 %v381_v1, %v1190_v0  ;;  %v384_v5 = vld [vmem:[%s317_s19] sm:$0xff]  ;;  %s681_s22 = smul.u32 24, %s993_s30 }
  0x40   : > { %s658_s13 = sld [smem:[#allocation4 + $0x1]]  ;;  %v385_v7 = vsub.f32 %v383_v2, %v384_v5  ;;  %s1196_s17 = scalar_lea.vmem [#allocation13], %s682_s10 }
  0x41   : > { %s659_s26 = sld [smem:[#allocation3 + $0x1]]  ;;  %v387_v10 = vmul.f32 %v382_v4, %v382_v4  ;;  %s485_s30 = sshll.u32 %s1196_s17, 4  ;;  %s486_s30 = int_to_ptr.vmem [resolvable:$true] %s485_s30 }
  0x42   : > { %s660_s23 = sld [smem:[#allocation4 + $0x2]]  ;;  %v393_v12 = vmul.f32 %v385_v7, %v385_v7 }
  0x43   : > { %s661_s27 = sld [smem:[#allocation3 + $0x2]]  ;;  %390 = vst [vmem:[%s1196_s17] sm:$0xff] %v387_v10 }
  0x44   : > { %v398_v3 = vstv %s397_s12  ;;  %s662_s14 = sld [smem:[#allocation4 + $0x3]]  ;;  %657 = vst [vmem:[%s1196_s17 + $0x8] sm:$0xff] %v393_v12 }
  0x45   : > { %vm399_vm0 = vcmp.ge.f32.partialorder %v1190_v0, %v398_v3  ;;  %v401_v6 = vstv %s400_s9  ;;  %s663_s15 = sld [smem:[#allocation3 + $0x3]] }
  0x46   : > { %v402_v8 = vsel %vm399_vm0, %v401_v6, 0.0  ;;  %v405_v9 = vstv %s658_s13  ;;  %s664_s24 = sld [smem:[#allocation4 + $0x4]] }
  0x47   : > { %vm406_vm1 = vcmp.ge.f32.partialorder %v1190_v0, %v405_v9  ;;  %v408_v11 = vstv %s659_s26  ;;  %s665_s25 = sld [smem:[#allocation3 + $0x4]]  ;;  %s484_s26 = scalar_lea.hbm %s1252_s6, %s681_s22 }
  0x48   : > { %v409_v13 = vsel %vm406_vm1, %v408_v11, 0.0  ;;  %v412_v14 = vstv %s660_s23  ;;  %s666_s28 = sld [smem:[#allocation4 + $0x5]]  ;;  %s487_s23 = sshll.u32 %s484_s26, 4  ;;  %s488_s23 = int_to_ptr.hbm [resolvable:$true] %s487_s23 }
  0x49   : > { %v410_v15 = vadd.f32 %v409_v13, %v402_v8  ;;  %vm413_vm2 = vcmp.ge.f32.partialorder %v1190_v0, %v412_v14  ;;  %v415_v16 = vstv %s661_s27  ;;  %s667_s3 = sld [smem:[#allocation3 + $0x5]]  ;;  %s473_s27 = scalar_lea.sflag [#allocation7], %s1171_s11 }
  0x4a   : > { %v416_v17 = vsel %vm413_vm2, %v415_v16, 0.0  ;;  %v419_v18 = vstv %s662_s14  ;;  %s668_s7 = sld [smem:[#allocation4 + $0x6]]  ;;  %s923_s10 = sshra.s32 %s488_s23, 4  ;;  %s924_s10 = int_to_ptr.hbm [resolvable:$true] %s923_s10 }
  0x4b   : > { %v417_v19 = vadd.f32 %v416_v17, %v410_v15  ;;  %vm420_vm3 = vcmp.ge.f32.partialorder %v1190_v0, %v419_v18  ;;  %v422_v20 = vstv %s663_s15  ;;  %s669_s21 = sld [smem:[#allocation3 + $0x6]]  ;;  %s925_s14 = scalar_lea.hbm %s924_s10, 24 }
  0x4c   : > { %v423_v21 = vsel %vm420_vm3, %v422_v20, 0.0  ;;  %v426_v22 = vstv %s664_s24  ;;  %s670_s2 = sld [smem:[#allocation4 + $0x7]]  ;;  %p926_p4 = scmp.ne.s32.totalorder %s924_s10, %s925_s14 }
  0x4d   : > { %v424_v23 = vadd.f32 %v423_v21, %v417_v19  ;;  %vm427_vm4 = vcmp.ge.f32.partialorder %v1190_v0, %v426_v22  ;;  %v429_v24 = vstv %s665_s25  ;;  %s671_s29 = sld [smem:[#allocation3 + $0x7]]  ;;  %s929_s25 = scalar_lea.hbm %s1252_s6, 48 }
  0x4e   : > { %v430_v25 = vsel %vm427_vm4, %v429_v24, 0.0  ;;  %v433_v26 = vstv %s666_s28  ;;  %s672_s8 = sld [smem:[#allocation4 + $0x8]]  ;;  %p927_p5 = pnand %p926_p4, %p1103_p9 }
  0x4f   : > { %v431_v27 = vadd.f32 %v430_v25, %v424_v23  ;;  %vm434_vm5 = vcmp.ge.f32.partialorder %v1190_v0, %v433_v26  ;;  %v436_v28 = vstv %s667_s3  ;;  %s673_s19 = sld [smem:[#allocation3 + $0x8]]  ;;  %p930_p7 = scmp.lt.s32.totalorder %s924_s10, %s1252_s6 }
  0x50   : > { %v437_v29 = vsel %vm434_vm5, %v436_v28, 0.0  ;;  %v440_v30 = vstv %s668_s7  ;;  %s674_s20 = sld [smem:[#allocation4 + $0x9]]  ;;  %p928_p6 = pneg %p927_p5 }
  0x51   : > { %v438_v31 = vadd.f32 %v437_v29, %v431_v27  ;;  %vm441_vm6 = vcmp.ge.f32.partialorder %v1190_v0, %v440_v30  ;;  %v443_v32 = vstv %s669_s21  ;;  %s675_s12 = sld [smem:[#allocation3 + $0x9]]  ;;  %p931_p8 = scmp.lt.s32.totalorder %s929_s25, %s925_s14 }
  0x52   : > { %v444_v33 = vsel %vm441_vm6, %v443_v32, 0.0  ;;  %v447_v34 = vstv %s670_s2 }
  0x53   : > { %v445_v35 = vadd.f32 %v444_v33, %v438_v31  ;;  %vm448_vm7 = vcmp.ge.f32.partialorder %v1190_v0, %v447_v34  ;;  %v450_v36 = vstv %s671_s29  ;;  %p932_p10 = por %p931_p8, %p930_p7 }
  0x54   : > { %v451_v37 = vsel %vm448_vm7, %v450_v36, 0.0  ;;  %v454_v38 = vstv %s672_s8 }
  0x55   : > { %v452_v39 = vadd.f32 %v451_v37, %v445_v35  ;;  %vm455_vm8 = vcmp.ge.f32.partialorder %v1190_v0, %v454_v38  ;;  %v457_v40 = vstv %s673_s19  ;;  %p933_p13 = pnand %p932_p10, %p928_p6 }
  0x56   : > { %v458_v41 = vsel %vm455_vm8, %v457_v40, 0.0  ;;  %v461_v42 = vstv %s674_s20 }
  0x57   : > { %v459_v43 = vadd.f32 %v458_v41, %v452_v39  ;;  %vm462_vm9 = vcmp.ge.f32.partialorder %v1190_v0, %v461_v42  ;;  %v464_v44 = vstv %s675_s12 }
  0x58   : > { %v465_v45 = vsel %vm462_vm9, %v464_v44, 0.0 }
  0x59   : > { %v466_v46 = vadd.f32 %v465_v45, %v459_v43 }
  0x5b   : > { %677 = vst [vmem:[%s1196_s17 + $0x10] sm:$0xff] %v466_v46 }
  0x5c   : > { %936 = shalt.err (!%p933_p13)
}
  0x5d   : > { %s1005_s11 = smov 128   ;;  %s1006_s7 = smov 8  }
  0x5e   : > { %691 = dma.vmem_to_hbm [thread:$0]  (%p1103_p9), %s486_s30, 384, %s488_s23, %s473_s27, %s1005_s11, %s1005_s11, %s1006_s7  }
  0x5f PF: > { %s1274_s17 = sld [smem:[#allocation21_spill]]  ;;  %s502_s21 = sand.u32 1, %s981_s0  }
  0x60   : > { %p707_p0 = pnand %p642_p12, %p1110_p11  ;;  %s503_s2 = scalar_lea.sflag [#allocation7], %s502_s21 }
  0x62   : > { %p708_p1 = pneg %p707_p0 }
  0x64   : > { %976 = dma.done.wait (%p708_p1), %s503_s2, 384  }
  0x65   : > { %978 = vsyncadd (%p708_p1), %s503_s2, 4294966912  ;;  %s41_s8 = sadd.s32 1, %s1274_s17   ;;  %s1275_s29 = sld [smem:[#allocation19_spill]] }
  0x66   : > { %p38_p2 = scmp.ge.s32.totalorder %s41_s8, 4   ;;  %s1276_s19 = sld [smem:[#allocation23_spill]] }
  0x67   : > { %s1277_s30 = sld [smem:[#allocation20_spill]]  ;;  %s1279_s0 = smov %s985_s1 }
  0x68   : > { %s1278_s7 = sld [smem:[#allocation22_spill]]  ;;  %40 = sbr.rel (!%p38_p2) target bundleno = 18 (0x12), region = 124 }
  0x6b   : > { %s1280_s1 = smov %s1275_s29 }
  0x6c   : > { %s1281_s29 = smov %s1276_s19 }
  0x6d   :  { %509 = vsyncpa [#allocation6], 1 }
  0x6e   :  { %511 = vsyncpa [#allocation6 + $0x1], 1 }
  0x6f   :  { %512 = vsyncpa [#allocation9], 1 }
  0x70   :  { %514 = vsyncpa [#allocation9 + $0x1], 1 }
  0x71   :  { %515 = vsyncpa [#allocation12], 1 }
  0x72   :  { %517 = vsyncpa [#allocation12 + $0x1], 1 }
  0x73   :  { %518 = vsyncpa [#allocation7], 1 }
  0x74   :  { %520 = vsyncpa [#allocation7 + $0x1], 1 }

</bundles_post_ra>
